<compile_context>
chip_gen: v7x
topology: tpu7x:2x2x1
jax: 0.10.0
libtpu: 0.0.40
codegen_flags: <defaults>
</compile_context>

<pallas_src>
import math

import jax
import jax.numpy as jnp
from jax.experimental import pallas as pl
from jax.experimental.pallas import tpu as pltpu

BN_EPS = 1e-5
LANE = 128
SUBLANE = 8


def _round_up(x, m):
    return ((x + m - 1) // m) * m


# ----------------------------------------------------------------------------
# Parameter construction (deterministic, mirrors module __init__ shapes).
# ----------------------------------------------------------------------------
def build_autoencoder_params(key, input_dim, hidden_dims, latent_dim):
    """Returns (logical_blocks, n_encoder_blocks).

    logical_blocks: list of dicts per linear block (forward order, encoder
    then decoder) with PyTorch-layout W [out, in], b [out], optional
    gamma/beta [out], and flags relu/bn.
    """
    hidden_dims = list(hidden_dims) + [latent_dim]  # matches module __init__
    output_dim = input_dim

    # (din, dout, relu, bn) per linear block, in forward order.
    layer_dims = []
    for idx, hdim in enumerate(hidden_dims):            # encoder
        if idx == 0:
            layer_dims.append((input_dim, hdim, True, False))
        else:
            layer_dims.append((hidden_dims[idx - 1], hdim, True, True))
    tmp = hidden_dims[::-1]
    for idx, hdim in enumerate(tmp):                    # decoder
        if idx == len(tmp) - 1:
            layer_dims.append((hdim, output_dim, False, False))
        else:
            layer_dims.append((hdim, tmp[idx + 1], True, True))

    n_encoder_blocks = len(hidden_dims)

    logical_blocks = []
    for (din, dout, relu, bn) in layer_dims:
        key, kw, kb = jax.random.split(key, 3)
        bound = 1.0 / math.sqrt(float(din))             # PyTorch-style init
        W = jax.random.uniform(kw, (dout, din), jnp.float32, -bound, bound)
        b = jax.random.uniform(kb, (dout,), jnp.float32, -bound, bound)
        blk = {"W": W, "b": b, "relu": relu, "bn": bn, "din": din, "dout": dout}
        if bn:
            blk["gamma"] = jnp.ones((dout,), jnp.float32)
            blk["beta"] = jnp.zeros((dout,), jnp.float32)
        logical_blocks.append(blk)
    return logical_blocks, n_encoder_blocks


# ----------------------------------------------------------------------------
# Host-side packing: pre-transpose + lane-pad + bf16-cast weights, pack rows.
# ----------------------------------------------------------------------------
def pack_for_kernel(logical_blocks, input_dim, latent_dim, n_encoder_blocks):
    dmax = max(_round_up(b["dout"], LANE) for b in logical_blocks)

    weights = []
    rows = []
    meta = []
    for blk in logical_blocks:
        din_p = _round_up(blk["din"], LANE)
        dout_p = _round_up(blk["dout"], LANE)

        # Pre-transposed [in_dim_pad, out_dim_pad] weight, zero-padded, bf16.
        # Zero padding stays exactly zero after the bf16 cast.
        Wt = jnp.zeros((din_p, dout_p), jnp.float32)
        Wt = Wt.at[: blk["din"], : blk["dout"]].set(blk["W"].T)
        weights.append(Wt.astype(jnp.bfloat16))

        def pad_row(v, fill=0.0):
            r = jnp.full((dmax,), fill, jnp.float32)
            return r.at[: v.shape[0]].set(v)

        bias_row = len(rows)
        rows.append(pad_row(blk["b"]))
        if blk["bn"]:
            gamma_row = len(rows)
            # Pad gamma with 0 so padded lanes get scale=0 -> stay exactly 0.
            rows.append(pad_row(blk["gamma"], 0.0))
            beta_row = len(rows)
            rows.append(pad_row(blk["beta"]))
        else:
            gamma_row = beta_row = -1

        meta.append(
            dict(din_p=din_p, dout_p=dout_p, relu=blk["relu"], bn=blk["bn"],
                 bias_row=bias_row, gamma_row=gamma_row, beta_row=beta_row)
        )

    # Pad row count to a multiple of 8 sublanes (one clean f32 tile stack).
    n_rows_pad = _round_up(len(rows), SUBLANE)
    while len(rows) < n_rows_pad:
        rows.append(jnp.zeros((dmax,), jnp.float32))
    vecs = jnp.stack(rows, axis=0)  # [n_rows_pad, dmax] -- one consolidated input

    dims = dict(
        input_dim=input_dim,
        latent_dim=latent_dim,
        input_pad=meta[0]["din_p"],
        latent_pad=meta[n_encoder_blocks - 1]["dout_p"],
        n_encoder_blocks=n_encoder_blocks,
        dmax=dmax,
    )
    return weights, vecs, meta, dims


# ----------------------------------------------------------------------------
# Pallas kernel: whole forward pass fused, everything resident in VMEM.
# ----------------------------------------------------------------------------
def _make_kernel(meta, n_blocks, n_encoder_blocks):
    def kernel(x_ref, *refs):
        w_refs = refs[:n_blocks]
        vecs_ref = refs[n_blocks]
        recon_ref = refs[n_blocks + 1]
        latent_ref = refs[n_blocks + 2]

        h = x_ref[...]                                   # f32 activations
        inv_b = jnp.float32(1.0 / h.shape[0])
        for bi, m in enumerate(meta):
            dout_p = m["dout_p"]
            r = m["bias_row"]
            b = vecs_ref[r:r + 1, :dout_p]               # static ref-view slice
            W = w_refs[bi][...]                          # bf16 [din_p, dout_p]
            # MXU matmul: bf16 x bf16 operands, f32 accumulation; bias in f32.
            h = jnp.dot(h.astype(jnp.bfloat16), W,
                        preferred_element_type=jnp.float32) + b
            if m["relu"]:
                h = jnp.maximum(h, 0.0)
            if m["bn"]:
                g = m["gamma_row"]
                p = m["beta_row"]
                gamma = vecs_ref[g:g + 1, :dout_p]
                beta = vecs_ref[p:p + 1, :dout_p]
                # Single-sweep batch statistics (sum + sum of squares), f32.
                s1 = jnp.sum(h, axis=0, keepdims=True)
                s2 = jnp.sum(h * h, axis=0, keepdims=True)
                mean = s1 * inv_b
                var = jnp.maximum(s2 * inv_b - mean * mean, 0.0)  # biased var
                scale = gamma * jax.lax.rsqrt(var + BN_EPS)       # EUP
                shift = beta - mean * scale
                h = h * scale + shift                             # fused affine
            if bi == n_encoder_blocks - 1:
                latent_ref[...] = h.astype(latent_ref.dtype)
        recon_ref[...] = h.astype(recon_ref.dtype)

    return kernel


def _derive_vmem_limit(weights, vecs, batch, dims):
    """Generation-aware VMEM budget derived from the actual packed footprint."""
    w_bytes = sum(int(w.size) * w.dtype.itemsize for w in weights)
    vec_bytes = int(vecs.size) * 4
    dmax = dims["dmax"]
    act_bytes = batch * dmax * 4                     # one f32 activation slab
    io_bytes = batch * (2 * dims["input_pad"] + dims["latent_pad"]) * 4
    # 2x inputs/outputs for double-buffered DMA, 4x activation slabs for dot
    # input/output liveness, plus fixed headroom for compiler temporaries.
    needed = 2 * (w_bytes + vec_bytes + io_bytes) + 4 * act_bytes + (8 << 20)
    try:
        cap = int(0.75 * pltpu.get_tpu_info().vmem_capacity_bytes)
    except Exception:
        cap = 48 << 20                               # safe on v7x (64 MiB / TC)
    return int(min(cap, max(needed, 32 << 20)))


def autoencoder_apply(x, weights, vecs, meta, dims):
    """One pallas_call -> (reconstruction, latent), both sliced to logical dims."""
    batch, input_dim = x.shape
    assert input_dim == dims["input_dim"]
    input_pad = dims["input_pad"]
    latent_pad = dims["latent_pad"]
    n_blocks = len(meta)

    if input_pad != input_dim:
        x = jnp.pad(x, ((0, 0), (0, input_pad - input_dim)))

    kernel = _make_kernel(meta, n_blocks, dims["n_encoder_blocks"])
    vmem = pl.BlockSpec(memory_space=pltpu.MemorySpace.VMEM)
    vmem_limit = _derive_vmem_limit(weights, vecs, batch, dims)

    recon_p, latent_p = pl.pallas_call(
        kernel,
        out_shape=(
            jax.ShapeDtypeStruct((batch, input_pad), jnp.float32),
            jax.ShapeDtypeStruct((batch, latent_pad), jnp.float32),
        ),
        in_specs=[vmem] * (1 + n_blocks + 1),
        out_specs=(vmem, vmem),
        compiler_params=pltpu.CompilerParams(vmem_limit_bytes=vmem_limit),
    )(x, *weights, vecs)

    return recon_p[:, :input_dim], latent_p[:, : dims["latent_dim"]]


def autoencoder_forward(x, packed, latent=False):
    """Mirrors AutoEncoder.forward(X, latent)."""
    recon, z = autoencoder_apply(x, *packed)
    return z if latent else recon


# ----------------------------------------------------------------------------
# Pure-JAX reference for sanity checking (logical, unpadded params).
# mm_dtype=bfloat16 mirrors the kernel's matmul precision for a tight check.
# ----------------------------------------------------------------------------
def reference_forward(x, logical_blocks, n_encoder_blocks, latent=False,
                      mm_dtype=jnp.float32):
    active = logical_blocks[:n_encoder_blocks] if latent else logical_blocks
    h = x
    for blk in active:
        h = jnp.dot(h.astype(mm_dtype), blk["W"].T.astype(mm_dtype),
                    preferred_element_type=jnp.float32) + blk["b"]
        if blk["relu"]:
            h = jnp.maximum(h, 0.0)
        if blk["bn"]:
            mean = jnp.mean(h, axis=0, keepdims=True)
            var = jnp.mean((h - mean) ** 2, axis=0, keepdims=True)
            h = (h - mean) * jax.lax.rsqrt(var + BN_EPS) * blk["gamma"] + blk["beta"]
    return h


if __name__ == "__main__":
    # Small shapes consistent with the module: AutoEncoder(32, [64, 32], 16, 4)
    input_dim = 32
    hidden_dims = [64, 32]
    latent_dim = 16
    n_clusters = 4  # unused in forward
    batch = 8

    key = jax.random.PRNGKey(0)
    key, kx = jax.random.split(key)
    x = jax.random.normal(kx, (batch, input_dim), jnp.float32)

    logical_blocks, n_enc = build_autoencoder_params(
        key, input_dim, hidden_dims, latent_dim
    )
    packed = pack_for_kernel(logical_blocks, input_dim, latent_dim, n_enc)

    # Single fused kernel launch -> both reconstruction and latent.
    recon, z = autoencoder_apply(x, *packed)
    recon = jax.block_until_ready(recon)
    z = jax.block_until_ready(z)
    assert recon.shape == (batch, input_dim)
    assert z.shape == (batch, latent_dim)

    # Tight check vs a reference that mirrors the kernel's bf16 matmul operands.
    ref_recon_bf = reference_forward(x, logical_blocks, n_enc, latent=False,
                                     mm_dtype=jnp.bfloat16)
    ref_z_bf = reference_forward(x, logical_blocks, n_enc, latent=True,
                                 mm_dtype=jnp.bfloat16)
    assert jnp.allclose(recon, ref_recon_bf, atol=2e-3, rtol=2e-3)
    assert jnp.allclose(z, ref_z_bf, atol=2e-3, rtol=2e-3)

    # Loose semantic check vs the full-f32 reference (bf16 matmul rounding).
    ref_recon = reference_forward(x, logical_blocks, n_enc, latent=False)
    ref_z = reference_forward(x, logical_blocks, n_enc, latent=True)
    assert jnp.allclose(recon, ref_recon, atol=1e-1, rtol=1e-1)
    assert jnp.allclose(z, ref_z, atol=1e-1, rtol=1e-1)

    # Flag-style wrapper (module semantics) also works.
    z2 = jax.block_until_ready(autoencoder_forward(x, packed, latent=True))
    assert jnp.allclose(z2, ref_z_bf, atol=2e-3, rtol=2e-3)

    print("KERNEL_OK")
</pallas_src>

<mosaic_0001>
module attributes {stable_mosaic.version = 11 : i64} {
  func.func @kernel(%arg0: memref<8x128xf32, #tpu.memory_space<vmem>>, %arg1: memref<128x128xbf16, #tpu.memory_space<vmem>>, %arg2: memref<128x128xbf16, #tpu.memory_space<vmem>>, %arg3: memref<128x128xbf16, #tpu.memory_space<vmem>>, %arg4: memref<128x128xbf16, #tpu.memory_space<vmem>>, %arg5: memref<128x128xbf16, #tpu.memory_space<vmem>>, %arg6: memref<128x128xbf16, #tpu.memory_space<vmem>>, %arg7: memref<16x128xf32, #tpu.memory_space<vmem>>, %arg8: memref<8x128xf32, #tpu.memory_space<vmem>>, %arg9: memref<8x128xf32, #tpu.memory_space<vmem>>) attributes {dimension_semantics = [], scalar_prefetch = 0 : i64, scratch_operands = 0 : i64, tpu.core_type = #tpu.core_type<tc>} {
    %c0 = arith.constant 0 : index
    %c0_0 = arith.constant 0 : index
    %0 = vector.load %arg0[%c0, %c0_0] : memref<8x128xf32, #tpu.memory_space<vmem>>, vector<8x128xf32>
    %c0_1 = arith.constant 0 : index
    %c0_2 = arith.constant 0 : index
    %1 = vector.load %arg7[%c0_1, %c0_2] : memref<16x128xf32, #tpu.memory_space<vmem>>, vector<1x128xf32>
    %c0_3 = arith.constant 0 : index
    %c0_4 = arith.constant 0 : index
    %2 = vector.load %arg1[%c0_3, %c0_4] : memref<128x128xbf16, #tpu.memory_space<vmem>>, vector<128x128xbf16>
    %3 = arith.truncf %0 : vector<8x128xf32> to vector<8x128xbf16>
    %cst = arith.constant dense<0.000000e+00> : vector<8x128xf32>
    %4 = tpu.matmul %3, %2, %cst {dimension_numbers = #tpu.dot_dimension_numbers<[1], [0], [0], [1], [0, 0, 1, 1], [], []>} : vector<8x128xbf16>, vector<128x128xbf16>, vector<8x128xf32> -> vector<8x128xf32>
    %5 = vector.broadcast %1 : vector<1x128xf32> to vector<8x128xf32>
    %6 = arith.addf %4, %5 : vector<8x128xf32>
    %cst_5 = arith.constant 0.000000e+00 : f32
    %7 = vector.broadcast %cst_5 : f32 to vector<8x128xf32>
    %8 = arith.maximumf %6, %7 : vector<8x128xf32>
    %c1 = arith.constant 1 : index
    %c0_6 = arith.constant 0 : index
    %9 = vector.load %arg7[%c1, %c0_6] : memref<16x128xf32, #tpu.memory_space<vmem>>, vector<1x128xf32>
    %c0_7 = arith.constant 0 : index
    %c0_8 = arith.constant 0 : index
    %10 = vector.load %arg2[%c0_7, %c0_8] : memref<128x128xbf16, #tpu.memory_space<vmem>>, vector<128x128xbf16>
    %11 = arith.truncf %8 : vector<8x128xf32> to vector<8x128xbf16>
    %cst_9 = arith.constant dense<0.000000e+00> : vector<8x128xf32>
    %12 = tpu.matmul %11, %10, %cst_9 {dimension_numbers = #tpu.dot_dimension_numbers<[1], [0], [0], [1], [0, 0, 1, 1], [], []>} : vector<8x128xbf16>, vector<128x128xbf16>, vector<8x128xf32> -> vector<8x128xf32>
    %13 = vector.broadcast %9 : vector<1x128xf32> to vector<8x128xf32>
    %14 = arith.addf %12, %13 : vector<8x128xf32>
    %cst_10 = arith.constant 0.000000e+00 : f32
    %15 = vector.broadcast %cst_10 : f32 to vector<8x128xf32>
    %16 = arith.maximumf %14, %15 : vector<8x128xf32>
    %c2 = arith.constant 2 : index
    %c0_11 = arith.constant 0 : index
    %17 = vector.load %arg7[%c2, %c0_11] : memref<16x128xf32, #tpu.memory_space<vmem>>, vector<1x128xf32>
    %c3 = arith.constant 3 : index
    %c0_12 = arith.constant 0 : index
    %18 = vector.load %arg7[%c3, %c0_12] : memref<16x128xf32, #tpu.memory_space<vmem>>, vector<1x128xf32>
    %cst_13 = arith.constant dense<0.000000e+00> : vector<128xf32>
    %19 = vector.multi_reduction <add>, %16, %cst_13 [0] : vector<8x128xf32> to vector<128xf32>
    %20 = vector.shape_cast %19 : vector<128xf32> to vector<1x128xf32>
    %21 = arith.mulf %16, %16 : vector<8x128xf32>
    %cst_14 = arith.constant dense<0.000000e+00> : vector<128xf32>
    %22 = vector.multi_reduction <add>, %21, %cst_14 [0] : vector<8x128xf32> to vector<128xf32>
    %23 = vector.shape_cast %22 : vector<128xf32> to vector<1x128xf32>
    %cst_15 = arith.constant 1.250000e-01 : f32
    %24 = vector.broadcast %cst_15 : f32 to vector<1x128xf32>
    %25 = arith.mulf %20, %24 : vector<1x128xf32>
    %cst_16 = arith.constant 1.250000e-01 : f32
    %26 = vector.broadcast %cst_16 : f32 to vector<1x128xf32>
    %27 = arith.mulf %23, %26 : vector<1x128xf32>
    %28 = arith.mulf %25, %25 : vector<1x128xf32>
    %29 = arith.subf %27, %28 : vector<1x128xf32>
    %cst_17 = arith.constant 0.000000e+00 : f32
    %30 = vector.broadcast %cst_17 : f32 to vector<1x128xf32>
    %31 = arith.maximumf %29, %30 : vector<1x128xf32>
    %cst_18 = arith.constant 9.99999974E-6 : f32
    %32 = vector.broadcast %cst_18 : f32 to vector<1x128xf32>
    %33 = arith.addf %31, %32 : vector<1x128xf32>
    %34 = math.rsqrt %33 : vector<1x128xf32>
    %35 = arith.mulf %17, %34 : vector<1x128xf32>
    %36 = arith.mulf %25, %35 : vector<1x128xf32>
    %37 = arith.subf %18, %36 : vector<1x128xf32>
    %38 = vector.broadcast %35 : vector<1x128xf32> to vector<8x128xf32>
    %39 = arith.mulf %16, %38 : vector<8x128xf32>
    %40 = vector.broadcast %37 : vector<1x128xf32> to vector<8x128xf32>
    %41 = arith.addf %39, %40 : vector<8x128xf32>
    %c4 = arith.constant 4 : index
    %c0_19 = arith.constant 0 : index
    %42 = vector.load %arg7[%c4, %c0_19] : memref<16x128xf32, #tpu.memory_space<vmem>>, vector<1x128xf32>
    %c0_20 = arith.constant 0 : index
    %c0_21 = arith.constant 0 : index
    %43 = vector.load %arg3[%c0_20, %c0_21] : memref<128x128xbf16, #tpu.memory_space<vmem>>, vector<128x128xbf16>
    %44 = arith.truncf %41 : vector<8x128xf32> to vector<8x128xbf16>
    %cst_22 = arith.constant dense<0.000000e+00> : vector<8x128xf32>
    %45 = tpu.matmul %44, %43, %cst_22 {dimension_numbers = #tpu.dot_dimension_numbers<[1], [0], [0], [1], [0, 0, 1, 1], [], []>} : vector<8x128xbf16>, vector<128x128xbf16>, vector<8x128xf32> -> vector<8x128xf32>
    %46 = vector.broadcast %42 : vector<1x128xf32> to vector<8x128xf32>
    %47 = arith.addf %45, %46 : vector<8x128xf32>
    %cst_23 = arith.constant 0.000000e+00 : f32
    %48 = vector.broadcast %cst_23 : f32 to vector<8x128xf32>
    %49 = arith.maximumf %47, %48 : vector<8x128xf32>
    %c5 = arith.constant 5 : index
    %c0_24 = arith.constant 0 : index
    %50 = vector.load %arg7[%c5, %c0_24] : memref<16x128xf32, #tpu.memory_space<vmem>>, vector<1x128xf32>
    %c6 = arith.constant 6 : index
    %c0_25 = arith.constant 0 : index
    %51 = vector.load %arg7[%c6, %c0_25] : memref<16x128xf32, #tpu.memory_space<vmem>>, vector<1x128xf32>
    %cst_26 = arith.constant dense<0.000000e+00> : vector<128xf32>
    %52 = vector.multi_reduction <add>, %49, %cst_26 [0] : vector<8x128xf32> to vector<128xf32>
    %53 = vector.shape_cast %52 : vector<128xf32> to vector<1x128xf32>
    %54 = arith.mulf %49, %49 : vector<8x128xf32>
    %cst_27 = arith.constant dense<0.000000e+00> : vector<128xf32>
    %55 = vector.multi_reduction <add>, %54, %cst_27 [0] : vector<8x128xf32> to vector<128xf32>
    %56 = vector.shape_cast %55 : vector<128xf32> to vector<1x128xf32>
    %cst_28 = arith.constant 1.250000e-01 : f32
    %57 = vector.broadcast %cst_28 : f32 to vector<1x128xf32>
    %58 = arith.mulf %53, %57 : vector<1x128xf32>
    %cst_29 = arith.constant 1.250000e-01 : f32
    %59 = vector.broadcast %cst_29 : f32 to vector<1x128xf32>
    %60 = arith.mulf %56, %59 : vector<1x128xf32>
    %61 = arith.mulf %58, %58 : vector<1x128xf32>
    %62 = arith.subf %60, %61 : vector<1x128xf32>
    %cst_30 = arith.constant 0.000000e+00 : f32
    %63 = vector.broadcast %cst_30 : f32 to vector<1x128xf32>
    %64 = arith.maximumf %62, %63 : vector<1x128xf32>
    %cst_31 = arith.constant 9.99999974E-6 : f32
    %65 = vector.broadcast %cst_31 : f32 to vector<1x128xf32>
    %66 = arith.addf %64, %65 : vector<1x128xf32>
    %67 = math.rsqrt %66 : vector<1x128xf32>
    %68 = arith.mulf %50, %67 : vector<1x128xf32>
    %69 = arith.mulf %58, %68 : vector<1x128xf32>
    %70 = arith.subf %51, %69 : vector<1x128xf32>
    %71 = vector.broadcast %68 : vector<1x128xf32> to vector<8x128xf32>
    %72 = arith.mulf %49, %71 : vector<8x128xf32>
    %73 = vector.broadcast %70 : vector<1x128xf32> to vector<8x128xf32>
    %74 = arith.addf %72, %73 : vector<8x128xf32>
    %c0_32 = arith.constant 0 : index
    %c0_33 = arith.constant 0 : index
    %75 = vector.load %arg9[%c0_32, %c0_33] : memref<8x128xf32, #tpu.memory_space<vmem>>, vector<8x128xf32>
    tpu.vector_store %arg9[%c0_32, %c0_33], %74 {strides = array<i32>} : memref<8x128xf32, #tpu.memory_space<vmem>>, vector<8x128xf32>,
    %c7 = arith.constant 7 : index
    %c0_34 = arith.constant 0 : index
    %76 = vector.load %arg7[%c7, %c0_34] : memref<16x128xf32, #tpu.memory_space<vmem>>, vector<1x128xf32>
    %c0_35 = arith.constant 0 : index
    %c0_36 = arith.constant 0 : index
    %77 = vector.load %arg4[%c0_35, %c0_36] : memref<128x128xbf16, #tpu.memory_space<vmem>>, vector<128x128xbf16>
    %78 = arith.truncf %74 : vector<8x128xf32> to vector<8x128xbf16>
    %cst_37 = arith.constant dense<0.000000e+00> : vector<8x128xf32>
    %79 = tpu.matmul %78, %77, %cst_37 {dimension_numbers = #tpu.dot_dimension_numbers<[1], [0], [0], [1], [0, 0, 1, 1], [], []>} : vector<8x128xbf16>, vector<128x128xbf16>, vector<8x128xf32> -> vector<8x128xf32>
    %80 = vector.broadcast %76 : vector<1x128xf32> to vector<8x128xf32>
    %81 = arith.addf %79, %80 : vector<8x128xf32>
    %cst_38 = arith.constant 0.000000e+00 : f32
    %82 = vector.broadcast %cst_38 : f32 to vector<8x128xf32>
    %83 = arith.maximumf %81, %82 : vector<8x128xf32>
    %c8 = arith.constant 8 : index
    %c0_39 = arith.constant 0 : index
    %84 = vector.load %arg7[%c8, %c0_39] : memref<16x128xf32, #tpu.memory_space<vmem>>, vector<1x128xf32>
    %c9 = arith.constant 9 : index
    %c0_40 = arith.constant 0 : index
    %85 = vector.load %arg7[%c9, %c0_40] : memref<16x128xf32, #tpu.memory_space<vmem>>, vector<1x128xf32>
    %cst_41 = arith.constant dense<0.000000e+00> : vector<128xf32>
    %86 = vector.multi_reduction <add>, %83, %cst_41 [0] : vector<8x128xf32> to vector<128xf32>
    %87 = vector.shape_cast %86 : vector<128xf32> to vector<1x128xf32>
    %88 = arith.mulf %83, %83 : vector<8x128xf32>
    %cst_42 = arith.constant dense<0.000000e+00> : vector<128xf32>
    %89 = vector.multi_reduction <add>, %88, %cst_42 [0] : vector<8x128xf32> to vector<128xf32>
    %90 = vector.shape_cast %89 : vector<128xf32> to vector<1x128xf32>
    %cst_43 = arith.constant 1.250000e-01 : f32
    %91 = vector.broadcast %cst_43 : f32 to vector<1x128xf32>
    %92 = arith.mulf %87, %91 : vector<1x128xf32>
    %cst_44 = arith.constant 1.250000e-01 : f32
    %93 = vector.broadcast %cst_44 : f32 to vector<1x128xf32>
    %94 = arith.mulf %90, %93 : vector<1x128xf32>
    %95 = arith.mulf %92, %92 : vector<1x128xf32>
    %96 = arith.subf %94, %95 : vector<1x128xf32>
    %cst_45 = arith.constant 0.000000e+00 : f32
    %97 = vector.broadcast %cst_45 : f32 to vector<1x128xf32>
    %98 = arith.maximumf %96, %97 : vector<1x128xf32>
    %cst_46 = arith.constant 9.99999974E-6 : f32
    %99 = vector.broadcast %cst_46 : f32 to vector<1x128xf32>
    %100 = arith.addf %98, %99 : vector<1x128xf32>
    %101 = math.rsqrt %100 : vector<1x128xf32>
    %102 = arith.mulf %84, %101 : vector<1x128xf32>
    %103 = arith.mulf %92, %102 : vector<1x128xf32>
    %104 = arith.subf %85, %103 : vector<1x128xf32>
    %105 = vector.broadcast %102 : vector<1x128xf32> to vector<8x128xf32>
    %106 = arith.mulf %83, %105 : vector<8x128xf32>
    %107 = vector.broadcast %104 : vector<1x128xf32> to vector<8x128xf32>
    %108 = arith.addf %106, %107 : vector<8x128xf32>
    %c10 = arith.constant 10 : index
    %c0_47 = arith.constant 0 : index
    %109 = vector.load %arg7[%c10, %c0_47] : memref<16x128xf32, #tpu.memory_space<vmem>>, vector<1x128xf32>
    %c0_48 = arith.constant 0 : index
    %c0_49 = arith.constant 0 : index
    %110 = vector.load %arg5[%c0_48, %c0_49] : memref<128x128xbf16, #tpu.memory_space<vmem>>, vector<128x128xbf16>
    %111 = arith.truncf %108 : vector<8x128xf32> to vector<8x128xbf16>
    %cst_50 = arith.constant dense<0.000000e+00> : vector<8x128xf32>
    %112 = tpu.matmul %111, %110, %cst_50 {dimension_numbers = #tpu.dot_dimension_numbers<[1], [0], [0], [1], [0, 0, 1, 1], [], []>} : vector<8x128xbf16>, vector<128x128xbf16>, vector<8x128xf32> -> vector<8x128xf32>
    %113 = vector.broadcast %109 : vector<1x128xf32> to vector<8x128xf32>
    %114 = arith.addf %112, %113 : vector<8x128xf32>
    %cst_51 = arith.constant 0.000000e+00 : f32
    %115 = vector.broadcast %cst_51 : f32 to vector<8x128xf32>
    %116 = arith.maximumf %114, %115 : vector<8x128xf32>
    %c11 = arith.constant 11 : index
    %c0_52 = arith.constant 0 : index
    %117 = vector.load %arg7[%c11, %c0_52] : memref<16x128xf32, #tpu.memory_space<vmem>>, vector<1x128xf32>
    %c12 = arith.constant 12 : index
    %c0_53 = arith.constant 0 : index
    %118 = vector.load %arg7[%c12, %c0_53] : memref<16x128xf32, #tpu.memory_space<vmem>>, vector<1x128xf32>
    %cst_54 = arith.constant dense<0.000000e+00> : vector<128xf32>
    %119 = vector.multi_reduction <add>, %116, %cst_54 [0] : vector<8x128xf32> to vector<128xf32>
    %120 = vector.shape_cast %119 : vector<128xf32> to vector<1x128xf32>
    %121 = arith.mulf %116, %116 : vector<8x128xf32>
    %cst_55 = arith.constant dense<0.000000e+00> : vector<128xf32>
    %122 = vector.multi_reduction <add>, %121, %cst_55 [0] : vector<8x128xf32> to vector<128xf32>
    %123 = vector.shape_cast %122 : vector<128xf32> to vector<1x128xf32>
    %cst_56 = arith.constant 1.250000e-01 : f32
    %124 = vector.broadcast %cst_56 : f32 to vector<1x128xf32>
    %125 = arith.mulf %120, %124 : vector<1x128xf32>
    %cst_57 = arith.constant 1.250000e-01 : f32
    %126 = vector.broadcast %cst_57 : f32 to vector<1x128xf32>
    %127 = arith.mulf %123, %126 : vector<1x128xf32>
    %128 = arith.mulf %125, %125 : vector<1x128xf32>
    %129 = arith.subf %127, %128 : vector<1x128xf32>
    %cst_58 = arith.constant 0.000000e+00 : f32
    %130 = vector.broadcast %cst_58 : f32 to vector<1x128xf32>
    %131 = arith.maximumf %129, %130 : vector<1x128xf32>
    %cst_59 = arith.constant 9.99999974E-6 : f32
    %132 = vector.broadcast %cst_59 : f32 to vector<1x128xf32>
    %133 = arith.addf %131, %132 : vector<1x128xf32>
    %134 = math.rsqrt %133 : vector<1x128xf32>
    %135 = arith.mulf %117, %134 : vector<1x128xf32>
    %136 = arith.mulf %125, %135 : vector<1x128xf32>
    %137 = arith.subf %118, %136 : vector<1x128xf32>
    %138 = vector.broadcast %135 : vector<1x128xf32> to vector<8x128xf32>
    %139 = arith.mulf %116, %138 : vector<8x128xf32>
    %140 = vector.broadcast %137 : vector<1x128xf32> to vector<8x128xf32>
    %141 = arith.addf %139, %140 : vector<8x128xf32>
    %c13 = arith.constant 13 : index
    %c0_60 = arith.constant 0 : index
    %142 = vector.load %arg7[%c13, %c0_60] : memref<16x128xf32, #tpu.memory_space<vmem>>, vector<1x128xf32>
    %c0_61 = arith.constant 0 : index
    %c0_62 = arith.constant 0 : index
    %143 = vector.load %arg6[%c0_61, %c0_62] : memref<128x128xbf16, #tpu.memory_space<vmem>>, vector<128x128xbf16>
    %144 = arith.truncf %141 : vector<8x128xf32> to vector<8x128xbf16>
    %cst_63 = arith.constant dense<0.000000e+00> : vector<8x128xf32>
    %145 = tpu.matmul %144, %143, %cst_63 {dimension_numbers = #tpu.dot_dimension_numbers<[1], [0], [0], [1], [0, 0, 1, 1], [], []>} : vector<8x128xbf16>, vector<128x128xbf16>, vector<8x128xf32> -> vector<8x128xf32>
    %146 = vector.broadcast %142 : vector<1x128xf32> to vector<8x128xf32>
    %147 = arith.addf %145, %146 : vector<8x128xf32>
    %c0_64 = arith.constant 0 : index
    %c0_65 = arith.constant 0 : index
    %148 = vector.load %arg8[%c0_64, %c0_65] : memref<8x128xf32, #tpu.memory_space<vmem>>, vector<8x128xf32>
    tpu.vector_store %arg8[%c0_64, %c0_65], %147 {strides = array<i32>} : memref<8x128xf32, #tpu.memory_space<vmem>>, vector<8x128xf32>,
    return
  }
}

</mosaic_0001>

<bundles_post_ra>
// kernel: tpu_custom_call.1
= control target key start
LH: loop header
LB: loop body
LE: loop exit
PB: predicated region body
PF: predicated region fallthrough
CT: control target
= control target key end

     0   :  { %15 = vsyncpa [#allocation3], 0  ;;  %s1775_s0 = inlined_call_operand.hbm [shape: f32[8,128], index: 0, kind: input, shape index: {}]   ;;  %s1776_s1 = inlined_call_operand.hbm [shape: bf16[128,128], index: 1, kind: input, shape index: {}]   ;;  %s1777_s2 = inlined_call_operand.hbm [shape: bf16[128,128], index: 2, kind: input, shape index: {}]   ;;  %s1778_s3 = inlined_call_operand.hbm [shape: bf16[128,128], index: 3, kind: input, shape index: {}]   ;;  %s1779_s4 = inlined_call_operand.hbm [shape: bf16[128,128], index: 4, kind: input, shape index: {}]   ;;  %s1780_s5 = inlined_call_operand.hbm [shape: bf16[128,128], index: 5, kind: input, shape index: {}]   ;;  %s1781_s6 = inlined_call_operand.hbm [shape: bf16[128,128], index: 6, kind: input, shape index: {}]   ;;  %s1782_s7 = inlined_call_operand.vmem [shape: f32[16,128], index: 7, kind: input, shape index: {}]   ;;  %s1783_s8 = inlined_call_operand.hbm [shape: f32[8,128], index: 8, kind: output, shape index: {0}]   ;;  %s1784_s9 = inlined_call_operand.hbm [shape: f32[8,128], index: 9, kind: output, shape index: {1}]  }
   0x1   :  { %16 = vsyncpa [#allocation6], 0 }
   0x2   :  { %17 = vsyncpa [#allocation9], 0 }
   0x3   :  { %18 = vsyncpa [#allocation12], 0 }
   0x4   :  { %19 = vsyncpa [#allocation4], 0 }
   0x5   :  { %20 = vsyncpa [#allocation16], 0  ;;  %s1474_s30 = smov [#allocation5]   ;;  %s1264_s13 = scalar_lea.hbm %s1776_s1, 1024 }
   0x6   :  { %s36_s10 = sshll.u32 %s1474_s30, 4  ;;  %p1265_p0 = scmp.ne.s32.totalorder %s1776_s1, %s1264_s13  ;;  %s37_s10 = int_to_ptr.vmem [resolvable:$true] %s36_s10 }
   0x7   :  { %p1268_p1 = scmp.lt.u32.totalorder %s1264_s13, %s1776_s1 }
   0x9   :  { %p1270_p2 = pnand %p1268_p1, %p1265_p0 }
   0xb   :  { %1273 = shalt.err (!%p1270_p2)
}
   0xc   :  { %s1274_s18 = scalar_lea.vmem %s37_s10, 1024  ;;  %p1279_p4 = scmp.lt.s32.totalorder %s37_s10, %s37_s10 }
   0xd   :  { %p1275_p3 = scmp.ne.s32.totalorder %s37_s10, %s1274_s18  ;;  %p1280_p5 = scmp.lt.s32.totalorder %s1274_s18, %s1274_s18 }
   0xf   :  { %p1281_p6 = por %p1280_p5, %p1279_p4 }
  0x11   :  { %p1282_p7 = pnand %p1281_p6, %p1275_p3 }
  0x13   :  { %1285 = shalt.err (!%p1282_p7)
}
  0x14   :  { %s1475_s19 = smov 64   ;;  %s1476_s20 = smov 4  }
  0x15   :  { %42 = dma.hbm_to_vmem [thread:$0]  %s1776_s1, 1024, %s37_s10, [#allocation6], %s1475_s19, %s1475_s19, %s1476_s20  }
  0x16   :  { %s1477_s23 = smov [#allocation8]   ;;  %s1478_s25 = smov [#allocation11]  }
  0x17   :  { %s60_s24 = sshll.u32 %s1477_s23, 4  ;;  %s84_s26 = sshll.u32 %s1478_s25, 4  ;;  %s61_s24 = int_to_ptr.vmem [resolvable:$true] %s60_s24  ;;  %s85_s26 = int_to_ptr.vmem [resolvable:$true] %s84_s26 }
  0x18   :  { %s1286_s29 = scalar_lea.hbm %s1778_s3, 1024 }
  0x19   :  { %p1287_p8 = scmp.ne.s32.totalorder %s1778_s3, %s1286_s29  ;;  %p1290_p9 = scmp.lt.u32.totalorder %s1286_s29, %s1778_s3 }
  0x1b   :  { %p1292_p10 = pnand %p1290_p9, %p1287_p8 }
  0x1d   :  { %1295 = shalt.err (!%p1292_p10)
}
  0x1e   :  { %s1296_s1 = scalar_lea.vmem %s61_s24, 1024  ;;  %p1301_p12 = scmp.lt.s32.totalorder %s61_s24, %s61_s24 }
  0x1f   :  { %p1297_p11 = scmp.ne.s32.totalorder %s61_s24, %s1296_s1  ;;  %p1302_p13 = scmp.lt.s32.totalorder %s1296_s1, %s1296_s1 }
  0x21   :  { %p1303_p0 = por %p1302_p13, %p1301_p12 }
  0x23   :  { %p1304_p1 = pnand %p1303_p0, %p1297_p11 }
  0x25   :  { %1307 = shalt.err (!%p1304_p1)
}
  0x26   :  { %66 = dma.hbm_to_vmem [thread:$0]  %s1778_s3, 1024, %s61_s24, [#allocation9], %s1475_s19, %s1475_s19, %s1476_s20  }
  0x27   :  { %s1308_s17 = scalar_lea.hbm %s1780_s5, 1024 }
  0x28   :  { %p1309_p2 = scmp.ne.s32.totalorder %s1780_s5, %s1308_s17  ;;  %p1312_p3 = scmp.lt.u32.totalorder %s1308_s17, %s1780_s5 }
  0x2a   :  { %p1314_p4 = pnand %p1312_p3, %p1309_p2 }
  0x2c   :  { %1317 = shalt.err (!%p1314_p4)
}
  0x2d   :  { %s1318_s25 = scalar_lea.vmem %s85_s26, 1024  ;;  %p1323_p6 = scmp.lt.s32.totalorder %s85_s26, %s85_s26 }
  0x2e   :  { %p1319_p5 = scmp.ne.s32.totalorder %s85_s26, %s1318_s25  ;;  %p1324_p7 = scmp.lt.s32.totalorder %s1318_s25, %s1318_s25 }
  0x30   :  { %p1325_p8 = por %p1324_p7, %p1323_p6 }
  0x32   :  { %p1326_p9 = pnand %p1325_p8, %p1319_p5 }
  0x34   :  { %1329 = shalt.err (!%p1326_p9)
}
  0x35   :  { %90 = dma.hbm_to_vmem [thread:$0]  %s1780_s5, 1024, %s85_s26, [#allocation12], %s1475_s19, %s1475_s19, %s1476_s20  }
  0x36   :  { %s1479_s27 = smov [#allocation2]   ;;  %s1480_s29 = smov [#allocation7]  }
  0x37   :  { %s27_s28 = sshll.u32 %s1479_s27, 4  ;;  %s48_s30 = sshll.u32 %s1480_s29, 4  ;;  %s28_s28 = int_to_ptr.vmem [resolvable:$true] %s27_s28  ;;  %s49_s30 = int_to_ptr.vmem [resolvable:$true] %s48_s30 }
  0x38   :  { %s1330_s13 = scalar_lea.hbm %s1775_s0, 128 }
  0x39   :  { %p1331_p10 = scmp.ne.s32.totalorder %s1775_s0, %s1330_s13  ;;  %p1334_p11 = scmp.lt.u32.totalorder %s1330_s13, %s1775_s0 }
  0x3b   :  { %p1336_p12 = pnand %p1334_p11, %p1331_p10 }
  0x3d   :  { %1339 = shalt.err (!%p1336_p12)
}
  0x3e   :  { %s1340_s5 = scalar_lea.vmem %s28_s28, 128  ;;  %p1345_p0 = scmp.lt.s32.totalorder %s28_s28, %s28_s28 }
  0x3f   :  { %p1341_p13 = scmp.ne.s32.totalorder %s28_s28, %s1340_s5  ;;  %p1346_p1 = scmp.lt.s32.totalorder %s1340_s5, %s1340_s5 }
  0x41   :  { %p1347_p2 = por %p1346_p1, %p1345_p0 }
  0x43   :  { %p1348_p3 = pnand %p1347_p2, %p1341_p13 }
  0x45   :  { %1351 = shalt.err (!%p1348_p3)
}
  0x46   :  { %30 = dma.hbm_to_vmem [thread:$0]  %s1775_s0, 128, %s28_s28, [#allocation3]  }
  0x47   :  { %s1352_s21 = scalar_lea.hbm %s1777_s2, 1024 }
  0x48   :  { %p1353_p4 = scmp.ne.s32.totalorder %s1777_s2, %s1352_s21  ;;  %p1356_p5 = scmp.lt.u32.totalorder %s1352_s21, %s1777_s2 }
  0x4a   :  { %p1358_p6 = pnand %p1356_p5, %p1353_p4 }
  0x4c   :  { %1361 = shalt.err (!%p1358_p6)
}
  0x4d   :  { %s1362_s24 = scalar_lea.vmem %s49_s30, 1024  ;;  %p1367_p8 = scmp.lt.s32.totalorder %s49_s30, %s49_s30 }
  0x4e   :  { %p1363_p7 = scmp.ne.s32.totalorder %s49_s30, %s1362_s24  ;;  %p1368_p9 = scmp.lt.s32.totalorder %s1362_s24, %s1362_s24 }
  0x50   :  { %p1369_p10 = por %p1368_p9, %p1367_p8 }
  0x52   :  { %p1370_p11 = pnand %p1369_p10, %p1363_p7 }
  0x54   :  { %1373 = shalt.err (!%p1370_p11)
}
  0x55   :  { %54 = dma.hbm_to_vmem [thread:$0]  %s1777_s2, 1024, %s49_s30, [#allocation6], %s1475_s19, %s1475_s19, %s1476_s20  }
  0x56   :  { %s1481_s28 = smov [#allocation10]   ;;  %s1482_s11 = smov [#allocation13]  }
  0x57   :  { %s72_s29 = sshll.u32 %s1481_s28, 4  ;;  %s96_s12 = sshll.u32 %s1482_s11, 4  ;;  %s73_s29 = int_to_ptr.vmem [resolvable:$true] %s72_s29  ;;  %s97_s12 = int_to_ptr.vmem [resolvable:$true] %s96_s12 }
  0x58   :  { %s1374_s10 = scalar_lea.hbm %s1779_s4, 1024 }
  0x59   :  { %p1375_p12 = scmp.ne.s32.totalorder %s1779_s4, %s1374_s10  ;;  %p1378_p13 = scmp.lt.u32.totalorder %s1374_s10, %s1779_s4 }
  0x5b   :  { %p1380_p0 = pnand %p1378_p13, %p1375_p12 }
  0x5d   :  { %1383 = shalt.err (!%p1380_p0)
}
  0x5e   :  { %s1384_s2 = scalar_lea.vmem %s73_s29, 1024  ;;  %p1389_p2 = scmp.lt.s32.totalorder %s73_s29, %s73_s29 }
  0x5f   :  { %p1385_p1 = scmp.ne.s32.totalorder %s73_s29, %s1384_s2  ;;  %p1390_p3 = scmp.lt.s32.totalorder %s1384_s2, %s1384_s2 }
  0x61   :  { %p1391_p4 = por %p1390_p3, %p1389_p2 }
  0x63   :  { %p1392_p5 = pnand %p1391_p4, %p1385_p1 }
  0x65   :  { %1395 = shalt.err (!%p1392_p5)
}
  0x66   :  { %78 = dma.hbm_to_vmem [thread:$0]  %s1779_s4, 1024, %s73_s29, [#allocation9], %s1475_s19, %s1475_s19, %s1476_s20  }
  0x67   :  { %s1396_s21 = scalar_lea.hbm %s1781_s6, 1024 }
  0x68   :  { %p1397_p6 = scmp.ne.s32.totalorder %s1781_s6, %s1396_s21  ;;  %p1400_p7 = scmp.lt.u32.totalorder %s1396_s21, %s1781_s6 }
  0x6a   :  { %p1402_p8 = pnand %p1400_p7, %p1397_p6 }
  0x6c   :  { %1405 = shalt.err (!%p1402_p8)
}
  0x6d   :  { %s1406_s24 = scalar_lea.vmem %s97_s12, 1024  ;;  %p1411_p10 = scmp.lt.s32.totalorder %s97_s12, %s97_s12 }
  0x6e   :  { %p1407_p9 = scmp.ne.s32.totalorder %s97_s12, %s1406_s24  ;;  %p1412_p11 = scmp.lt.s32.totalorder %s1406_s24, %s1406_s24 }
  0x70   :  { %p1413_p12 = por %p1412_p11, %p1411_p10 }
  0x72   :  { %p1414_p13 = pnand %p1413_p12, %p1407_p9 }
  0x74   :  { %1417 = shalt.err (!%p1414_p13)
}
  0x75   :  { %102 = dma.hbm_to_vmem [thread:$0]  %s1781_s6, 1024, %s97_s12, [#allocation12], %s1475_s19, %s1475_s19, %s1476_s20  }
  0x76   :  { %1462 = dma.done.wait [#allocation3], 128  }
  0x77   :  { %1463 = vsyncadd [#allocation3], 4294967168 }
  0x78   :  { %1464 = dma.done.wait [#allocation6], 2048  }
  0x79   :  { %1465 = vsyncadd [#allocation6], 4294965248 }
  0x7a   :  { %1466 = dma.done.wait [#allocation9], 2048  }
  0x7b   :  { %1467 = vsyncadd [#allocation9], 4294965248 }
  0x7c   :  { %1468 = dma.done.wait [#allocation12], 2048  }
  0x7d   :  { %1469 = vsyncadd [#allocation12], 4294965248  ;;  %v1483_v0 = vmov 0.0   ;;  %vm1484_vm0 = vmmov 0   ;;  %v1208_v1 = vld [vmem:[#allocation5] sm:$0xff]   ;;  %v1209_v2 = vld [vmem:[#allocation5 + $0x8] sm:$0xff]   ;;  %v375_v61 = vlaneseq }
  0x7e   :  { %1075 = vmatprep.subr.bf16.mxu0 %v1483_v0  ;;  %1091 = vmatprep.mubr.msk.bf16.mxu0 %vm1484_vm0, %v1483_v0  ;;  %v1210_v3 = vld [vmem:[#allocation5 + $0x10] sm:$0xff]   ;;  %v1216_v4 = vld [vmem:[#allocation7] sm:$0xff]   ;;  %v1211_v5 = vld [vmem:[#allocation5 + $0x18] sm:$0xff]   ;;  %s1485_s4 = smov [#allocation15]  }
  0x7f   :  { %1095 = vmatprep.subr.bf16.mxu1 %v1483_v0  ;;  %1111 = vmatprep.mubr.msk.bf16.mxu1 %vm1484_vm0, %v1483_v0  ;;  %v1217_v6 = vld [vmem:[#allocation7 + $0x8] sm:$0xff]   ;;  %v1212_v7 = vld [vmem:[#allocation5 + $0x20] sm:$0xff]   ;;  %v1218_v8 = vld [vmem:[#allocation7 + $0x10] sm:$0xff]   ;;  %v376_v62 = vshrl.u32 %v375_v61, 7  ;;  %s951_s0 = sshll.u32 %s1485_s4, 4  ;;  %s952_s0 = int_to_ptr.vmem [resolvable:$true] %s951_s0 }
  0x80   :  { %1076 = vmatpush3.bf16.msra.mxu0 %v1208_v1  ;;  %1096 = vmatpush3.bf16.msra.mxu1 %v1216_v4  ;;  %v1213_v9 = vld [vmem:[#allocation5 + $0x28] sm:$0xff]   ;;  %v1219_v10 = vld [vmem:[#allocation7 + $0x18] sm:$0xff]   ;;  %v1214_v11 = vld [vmem:[#allocation5 + $0x30] sm:$0xff]   ;;  %s1418_s6 = scalar_lea.vmem %s952_s0, 128  ;;  %p1423_p1 = scmp.lt.s32.totalorder %s952_s0, %s952_s0 }
  0x81   :  { %1077 = vmatprep.subr.bf16.mxu0 %v1483_v0  ;;  %1097 = vmatprep.subr.bf16.mxu1 %v1483_v0  ;;  %v1220_v12 = vld [vmem:[#allocation7 + $0x20] sm:$0xff]   ;;  %v1215_v13 = vld [vmem:[#allocation5 + $0x38] sm:$0xff]   ;;  %v1221_v15 = vld [vmem:[#allocation7 + $0x28] sm:$0xff]   ;;  %v1682_v1 = vsub.s32 0, %v376_v62  ;;  %p1419_p0 = scmp.ne.s32.totalorder %s952_s0, %s1418_s6  ;;  %p1424_p2 = scmp.lt.s32.totalorder %s1418_s6, %s1418_s6 }
  0x82   :  { %v127_v14 = vld [vmem:[#allocation2] sm:$0xff]  ;;  %v1222_v17 = vld [vmem:[#allocation7 + $0x30] sm:$0xff]   ;;  %v967_v19 = vld [vmem:[%s1782_s7] ss:$0 sm:$0xff] }
  0x83   :  { %v145_v16 = vpack.c.bf16 %v127_v14, %v127_v14  ;;  %v1223_v18 = vld [vmem:[#allocation7 + $0x38] sm:$0xff]   ;;  %v1224_v27 = vld [vmem:[#allocation8] sm:$0xff]   ;;  %v1225_v28 = vld [vmem:[#allocation8 + $0x8] sm:$0xff]   ;;  %p1425_p3 = por %p1424_p2, %p1423_p1 }
  0x84   :  { %1078 = vmatpush3.bf16.msra.mxu0 %v1209_v2  ;;  %1098 = vmatpush3.bf16.msra.mxu1 %v1217_v6  ;;  %v1226_v29 = vld [vmem:[#allocation8 + $0x10] sm:$0xff]   ;;  %v1227_v30 = vld [vmem:[#allocation8 + $0x18] sm:$0xff]   ;;  %v1228_v31 = vld [vmem:[#allocation8 + $0x20] sm:$0xff]  }
  0x85   :  { %1079 = vmatprep.subr.bf16.mxu0 %v1483_v0  ;;  %1099 = vmatprep.subr.bf16.mxu1 %v1483_v0  ;;  %v1229_v32 = vld [vmem:[#allocation8 + $0x28] sm:$0xff]   ;;  %v1230_v33 = vld [vmem:[#allocation8 + $0x30] sm:$0xff]   ;;  %v1231_v34 = vld [vmem:[#allocation8 + $0x38] sm:$0xff]   ;;  %p1426_p4 = pnand %p1425_p3, %p1419_p0 }
  0x86   :  { %v976_v35 = vld [vmem:[%s1782_s7 + $0x1] ss:$0 sm:$0xff]  ;;  %v350_v63 = vld [vmem:[%s1782_s7 + $0x2] sm:$0x1]  ;;  %v351_v4 = vld [vmem:[%s1782_s7 + $0x3] sm:$0x1] }
  0x87   :  { %v1234_v14 = vld [vmem:[#allocation10 + $0x10] sm:$0xff]   ;;  %v1244_v61 = vld [vmem:[#allocation11 + $0x20] sm:$0xff]   ;;  %v1245_v62 = vld [vmem:[#allocation11 + $0x28] sm:$0xff]  }
  0x88   :  { %1080 = vmatpush3.bf16.msra.mxu0 %v1210_v3  ;;  %1100 = vmatpush3.bf16.msra.mxu1 %v1218_v8 }
  0x89   :  { %1081 = vmatprep.subr.bf16.mxu0 %v1483_v0  ;;  %1101 = vmatprep.subr.bf16.mxu1 %v1483_v0 }
  0x8c   :  { %1082 = vmatpush3.bf16.msra.mxu0 %v1211_v5  ;;  %1102 = vmatpush3.bf16.msra.mxu1 %v1219_v10 }
  0x8d   :  { %1083 = vmatprep.subr.bf16.mxu0 %v1483_v0  ;;  %1103 = vmatprep.subr.bf16.mxu1 %v1483_v0 }
  0x90   :  { %1084 = vmatpush3.bf16.msra.mxu0 %v1212_v7  ;;  %1104 = vmatpush3.bf16.msra.mxu1 %v1220_v12  ;;  %v1232_v12 = vld [vmem:[#allocation10] sm:$0xff]  }
  0x91   :  { %1085 = vmatprep.subr.bf16.mxu0 %v1483_v0  ;;  %1105 = vmatprep.subr.bf16.mxu1 %v1483_v0 }
  0x94   :  { %1086 = vmatpush3.bf16.msra.mxu0 %v1213_v9  ;;  %1106 = vmatpush3.bf16.msra.mxu1 %v1221_v15  ;;  %v1235_v15 = vld [vmem:[#allocation10 + $0x18] sm:$0xff]  }
  0x95   :  { %1087 = vmatprep.subr.bf16.mxu0 %v1483_v0  ;;  %1107 = vmatprep.subr.bf16.mxu1 %v1483_v0 }
  0x98   :  { %1088 = vmatpush3.bf16.msra.mxu0 %v1214_v11  ;;  %1108 = vmatpush3.bf16.msra.mxu1 %v1222_v17  ;;  %v1237_v17 = vld [vmem:[#allocation10 + $0x28] sm:$0xff]  }
  0x99   :  { %1089 = vmatprep.subr.bf16.mxu0 %v1483_v0  ;;  %1109 = vmatprep.subr.bf16.mxu1 %v1483_v0 }
  0x9c   :  { %1090 = vmatpush3.bf16.msra.mxu0 %v1215_v13  ;;  %1110 = vmatpush3.bf16.msra.mxu1 %v1223_v18  ;;  %v1233_v13 = vld [vmem:[#allocation10 + $0x8] sm:$0xff]   ;;  %v1238_v18 = vld [vmem:[#allocation10 + $0x30] sm:$0xff]  }
  0x9d   :  { %1115 = vmatprep.subr.bf16.mxu0 %v1483_v0  ;;  %1135 = vmatprep.subr.bf16.mxu1 %v1483_v0 }
  0x9f   :  { %1092 = vmatmul.mubr.bf16.vlgmr.msra.gmra.mrb[0].mxu0 %v145_v16  ;;  %v1236_v16 = vld [vmem:[#allocation10 + $0x20] sm:$0xff]  }
  0xa0   :  { %1131 = vmatprep.mubr.msk.bf16.mxu0 %vm1484_vm0, %v1483_v0  ;;  %1116 = vmatpush3.bf16.msra.mxu0 %v1224_v27 }
  0xa1   :  { %1117 = vmatprep.subr.bf16.mxu0 %v1483_v0 }
  0xa4   :  { %1118 = vmatpush3.bf16.msra.mxu0 %v1225_v28 }
  0xa5   :  { %1119 = vmatprep.subr.bf16.mxu0 %v1483_v0 }
  0xa8   :  { %1120 = vmatpush3.bf16.msra.mxu0 %v1226_v29 }
  0xa9   :  { %1121 = vmatprep.subr.bf16.mxu0 %v1483_v0 }
  0xac   :  { %1122 = vmatpush3.bf16.msra.mxu0 %v1227_v30 }
  0xad   :  { %1123 = vmatprep.subr.bf16.mxu0 %v1483_v0 }
  0xb0   :  { %1124 = vmatpush3.bf16.msra.mxu0 %v1228_v31 }
  0xb1   :  { %1125 = vmatprep.subr.bf16.mxu0 %v1483_v0 }
  0xb4   :  { %1126 = vmatpush3.bf16.msra.mxu0 %v1229_v32 }
  0xb5   :  { %1127 = vmatprep.subr.bf16.mxu0 %v1483_v0 }
  0xb8   :  { %1128 = vmatpush3.bf16.msra.mxu0 %v1230_v33 }
  0xb9   :  { %1129 = vmatprep.subr.bf16.mxu0 %v1483_v0 }
  0xbc   :  { %1130 = vmatpush3.bf16.msra.mxu0 %v1231_v34 }
  0xbd   :  { %1155 = vmatprep.subr.bf16.mxu0 %v1483_v0 }
 0x172   :  { %v232_v20 = vpop.f32.mrb[0].mxu0 }
 0x173   :  { %v233_v21 = vadd.f32 %v967_v19, %v232_v20  ;;  %v1093_v22 = vpop.f32.mrb[1].mxu0  ;;  %v1239_v19 = vld [vmem:[#allocation10 + $0x38] sm:$0xff]   ;;  %v985_v20 = vld [vmem:[%s1782_s7 + $0x4] ss:$0 sm:$0xff] }
 0x174   :  { %v235_v23 = vpop.f32.mrb[2].mxu0 }
 0x175   :  { %v238_v24 = vmax.f32 %v233_v21, 0.0  ;;  %v1094_v25 = vpop.f32.mrb[3].mxu0 }
 0x177   :  { %v256_v26 = vpack.c.bf16 %v238_v24, %v238_v24 }
 0x179   :  { %1112 = vmatmul.mubr.bf16.vlgmr.msra.gmra.mrb[0].mxu1 %v256_v26 }
 0x17a   :  { %1151 = vmatprep.mubr.msk.bf16.mxu1 %vm1484_vm0, %v1483_v0  ;;  %1136 = vmatpush3.bf16.msra.mxu1 %v1232_v12 }
 0x17b   :  { %1137 = vmatprep.subr.bf16.mxu1 %v1483_v0 }
 0x17e   :  { %1138 = vmatpush3.bf16.msra.mxu1 %v1233_v13 }
 0x17f   :  { %1139 = vmatprep.subr.bf16.mxu1 %v1483_v0 }
 0x182   :  { %1140 = vmatpush3.bf16.msra.mxu1 %v1234_v14 }
 0x183   :  { %1141 = vmatprep.subr.bf16.mxu1 %v1483_v0 }
 0x186   :  { %1142 = vmatpush3.bf16.msra.mxu1 %v1235_v15 }
 0x187   :  { %1143 = vmatprep.subr.bf16.mxu1 %v1483_v0 }
 0x18a   :  { %1144 = vmatpush3.bf16.msra.mxu1 %v1236_v16 }
 0x18b   :  { %1145 = vmatprep.subr.bf16.mxu1 %v1483_v0 }
 0x18e   :  { %1146 = vmatpush3.bf16.msra.mxu1 %v1237_v17 }
 0x18f   :  { %1147 = vmatprep.subr.bf16.mxu1 %v1483_v0 }
 0x192   :  { %1148 = vmatpush3.bf16.msra.mxu1 %v1238_v18 }
 0x193   :  { %1149 = vmatprep.subr.bf16.mxu1 %v1483_v0 }
 0x196   :  { %1150 = vmatpush3.bf16.msra.mxu1 %v1239_v19 }
 0x197   :  { %1175 = vmatprep.subr.bf16.mxu1 %v1483_v0 }
 0x24c   :  { %v343_v36 = vpop.f32.mrb[0].mxu1 }
 0x24d   :  { %v344_v37 = vadd.f32 %v976_v35, %v343_v36  ;;  %v1113_v38 = vpop.f32.mrb[1].mxu1 }
 0x24e   :  { %v346_v39 = vpop.f32.mrb[2].mxu1 }
 0x24f   :  { %v349_v40 = vmax.f32 %v344_v37, 0.0  ;;  %v1114_v41 = vpop.f32.mrb[3].mxu1 }
 0x251   :  { %v352_v42 = vrot.slane %v349_v40, 4  ;;  %v358_v43 = vmul.f32 %v349_v40, %v349_v40 }
 0x253   :  { %v353_v44 = vadd.f32 %v352_v42, %v349_v40  ;;  %v359_v45 = vrot.slane %v358_v43, 4 }
 0x255   :  { %v354_v46 = vrot.slane %v353_v44, 2  ;;  %v360_v47 = vadd.f32 %v359_v45, %v358_v43 }
 0x257   :  { %v355_v48 = vadd.f32 %v354_v46, %v353_v44  ;;  %v361_v49 = vrot.slane %v360_v47, 2  ;;  %v496_v46 = vld [vmem:[%s1782_s7 + $0x5] sm:$0x1] }
 0x259   :  { %v356_v50 = vrot.slane %v355_v48, 1  ;;  %v362_v51 = vadd.f32 %v361_v49, %v360_v47  ;;  %v497_v49 = vld [vmem:[%s1782_s7 + $0x6] sm:$0x1] }
 0x25b   :  { %v357_v52 = vadd.f32 %v356_v50, %v355_v48  ;;  %v363_v53 = vrot.slane %v362_v51, 1 }
 0x25d   :  { %v364_v54 = vadd.f32 %v363_v53, %v362_v51  ;;  %v365_v55 = vmul.f32 0.125, %v357_v52 }
 0x25f   :  { %v366_v56 = vmul.f32 0.125, %v364_v54  ;;  %v367_v57 = vmul.f32 %v365_v55, %v365_v55 }
 0x261   :  { %v368_v58 = vsub.f32 %v366_v56, %v367_v57  ;;  %v1240_v57 = vld [vmem:[#allocation11] sm:$0xff]  }
 0x263   :  { %v369_v59 = vmax.f32 %v368_v58, 0.0  ;;  %v1241_v58 = vld [vmem:[#allocation11 + $0x8] sm:$0xff]  }
 0x265   :  { %v370_v60 = vadd.f32 1e-05, %v369_v59  ;;  %v1242_v59 = vld [vmem:[#allocation11 + $0x10] sm:$0xff]  }
 0x267   :  { %1256 = vrsqrt.f32 %v370_v60  ;;  %v1243_v60 = vld [vmem:[#allocation11 + $0x18] sm:$0xff]  }
 0x271   :  { %v1257_v2 = vpop.eup %1256 }
 0x272   :  { %v372_v3 = vmul.f32 %v1257_v2, %v350_v63  ;;  %v1246_v63 = vld [vmem:[#allocation11 + $0x30] sm:$0xff]   ;;  %v1247_v2 = vld [vmem:[#allocation11 + $0x38] sm:$0xff]  }
 0x274   :  { %v378_v5 = vrot.slane %v372_v3, %v1682_v1  ;;  %v373_v6 = vmul.f32 %v372_v3, %v365_v55  ;;  %v994_v3 = vld [vmem:[%s1782_s7 + $0x7] ss:$0 sm:$0xff] }
 0x276   :  { %v374_v7 = vsub.f32 %v351_v4, %v373_v6  ;;  %v379_v8 = vmul.f32 %v378_v5, %v349_v40 }
 0x278   :  { %v383_v9 = vrot.slane %v374_v7, %v1682_v1 }
 0x27a   :  { %v384_v10 = vadd.f32 %v383_v9, %v379_v8 }
 0x27c   :  { %v402_v11 = vpack.c.bf16 %v384_v10, %v384_v10 }
 0x27e   :  { %1132 = vmatmul.mubr.bf16.vlgmr.msra.gmra.mrb[4].mxu0 %v402_v11 }
 0x27f   :  { %1171 = vmatprep.mubr.msk.bf16.mxu0 %vm1484_vm0, %v1483_v0  ;;  %1156 = vmatpush3.bf16.msra.mxu0 %v1240_v57 }
 0x280   :  { %1157 = vmatprep.subr.bf16.mxu0 %v1483_v0 }
 0x283   :  { %1158 = vmatpush3.bf16.msra.mxu0 %v1241_v58 }
 0x284   :  { %1159 = vmatprep.subr.bf16.mxu0 %v1483_v0 }
 0x287   :  { %1160 = vmatpush3.bf16.msra.mxu0 %v1242_v59 }
 0x288   :  { %1161 = vmatprep.subr.bf16.mxu0 %v1483_v0 }
 0x28b   :  { %1162 = vmatpush3.bf16.msra.mxu0 %v1243_v60 }
 0x28c   :  { %1163 = vmatprep.subr.bf16.mxu0 %v1483_v0 }
 0x28f   :  { %1164 = vmatpush3.bf16.msra.mxu0 %v1244_v61 }
 0x290   :  { %1165 = vmatprep.subr.bf16.mxu0 %v1483_v0 }
 0x293   :  { %1166 = vmatpush3.bf16.msra.mxu0 %v1245_v62 }
 0x294   :  { %1167 = vmatprep.subr.bf16.mxu0 %v1483_v0 }
 0x297   :  { %1168 = vmatpush3.bf16.msra.mxu0 %v1246_v63 }
 0x298   :  { %1169 = vmatprep.subr.bf16.mxu0 %v1483_v0 }
 0x29b   :  { %1170 = vmatpush3.bf16.msra.mxu0 %v1247_v2 }
 0x351   :  { %v489_v21 = vpop.f32.mrb[4].mxu0 }
 0x352   :  { %v490_v22 = vadd.f32 %v985_v20, %v489_v21  ;;  %v1133_v23 = vpop.f32.mrb[5].mxu0 }
 0x353   :  { %v492_v24 = vpop.f32.mrb[6].mxu0 }
 0x354   :  { %v495_v25 = vmax.f32 %v490_v22, 0.0  ;;  %v1134_v26 = vpop.f32.mrb[7].mxu0 }
 0x356   :  { %v498_v27 = vrot.slane %v495_v25, 4  ;;  %v504_v28 = vmul.f32 %v495_v25, %v495_v25 }
 0x358   :  { %v499_v29 = vadd.f32 %v498_v27, %v495_v25  ;;  %v505_v30 = vrot.slane %v504_v28, 4 }
 0x35a   :  { %v500_v31 = vrot.slane %v499_v29, 2  ;;  %v506_v32 = vadd.f32 %v505_v30, %v504_v28 }
 0x35c   :  { %v501_v33 = vadd.f32 %v500_v31, %v499_v29  ;;  %v507_v34 = vrot.slane %v506_v32, 2  ;;  %v643_v29 = vld [vmem:[%s1782_s7 + $0x8] sm:$0x1] }
 0x35e   :  { %v502_v35 = vrot.slane %v501_v33, 1  ;;  %v508_v36 = vadd.f32 %v507_v34, %v506_v32  ;;  %v644_v32 = vld [vmem:[%s1782_s7 + $0x9] sm:$0x1] }
 0x360   :  { %v503_v37 = vadd.f32 %v502_v35, %v501_v33  ;;  %v509_v38 = vrot.slane %v508_v36, 1 }
 0x362   :  { %v510_v39 = vadd.f32 %v509_v38, %v508_v36  ;;  %v511_v40 = vmul.f32 0.125, %v503_v37 }
 0x364   :  { %v512_v41 = vmul.f32 0.125, %v510_v39  ;;  %v513_v42 = vmul.f32 %v511_v40, %v511_v40 }
 0x366   :  { %v514_v43 = vsub.f32 %v512_v41, %v513_v42  ;;  %v1249_v41 = vld [vmem:[#allocation13 + $0x8] sm:$0xff]   ;;  %v1250_v42 = vld [vmem:[#allocation13 + $0x10] sm:$0xff]  }
 0x368   :  { %v515_v44 = vmax.f32 %v514_v43, 0.0  ;;  %v1251_v43 = vld [vmem:[#allocation13 + $0x18] sm:$0xff]  }
 0x36a   :  { %v516_v45 = vadd.f32 1e-05, %v515_v44  ;;  %v1252_v44 = vld [vmem:[#allocation13 + $0x20] sm:$0xff]  }
 0x36c   :  { %1258 = vrsqrt.f32 %v516_v45  ;;  %v1253_v45 = vld [vmem:[#allocation13 + $0x28] sm:$0xff]  }
 0x376   :  { %v1259_v47 = vpop.eup %1258 }
 0x377   :  { %v518_v48 = vmul.f32 %v1259_v47, %v496_v46  ;;  %v1254_v46 = vld [vmem:[#allocation13 + $0x30] sm:$0xff]   ;;  %v1255_v47 = vld [vmem:[#allocation13 + $0x38] sm:$0xff]  }
 0x379   :  { %v519_v50 = vmul.f32 %v518_v48, %v511_v40  ;;  %v524_v51 = vrot.slane %v518_v48, %v1682_v1  ;;  %v1248_v40 = vld [vmem:[#allocation13] sm:$0xff]   ;;  %v1003_v48 = vld [vmem:[%s1782_s7 + $0xa] ss:$0 sm:$0xff] }
 0x37b   :  { %v520_v52 = vsub.f32 %v497_v49, %v519_v50  ;;  %v525_v53 = vmul.f32 %v524_v51, %v495_v25 }
 0x37d   :  { %v529_v54 = vrot.slane %v520_v52, %v1682_v1 }
 0x37f   :  { %v530_v55 = vadd.f32 %v529_v54, %v525_v53 }
 0x381   :  { %v549_v56 = vpack.c.bf16 %v530_v55, %v530_v55  ;;  %531 = vst [vmem:[#allocation15] sm:$0xff] %v530_v55 }
 0x383   :  { %1152 = vmatmul.mubr.bf16.vlgmr.msra.gmra.mrb[4].mxu1 %v549_v56 }
 0x384   :  { %1191 = vmatprep.mubr.msk.bf16.mxu1 %vm1484_vm0, %v1483_v0  ;;  %1176 = vmatpush3.bf16.msra.mxu1 %v1248_v40 }
 0x385   :  { %1177 = vmatprep.subr.bf16.mxu1 %v1483_v0 }
 0x388   :  { %1178 = vmatpush3.bf16.msra.mxu1 %v1249_v41 }
 0x389   :  { %1179 = vmatprep.subr.bf16.mxu1 %v1483_v0 }
 0x38c   :  { %1180 = vmatpush3.bf16.msra.mxu1 %v1250_v42 }
 0x38d   :  { %1181 = vmatprep.subr.bf16.mxu1 %v1483_v0 }
 0x390   :  { %1182 = vmatpush3.bf16.msra.mxu1 %v1251_v43 }
 0x391   :  { %1183 = vmatprep.subr.bf16.mxu1 %v1483_v0 }
 0x394   :  { %1184 = vmatpush3.bf16.msra.mxu1 %v1252_v44 }
 0x395   :  { %1185 = vmatprep.subr.bf16.mxu1 %v1483_v0 }
 0x398   :  { %1186 = vmatpush3.bf16.msra.mxu1 %v1253_v45 }
 0x399   :  { %1187 = vmatprep.subr.bf16.mxu1 %v1483_v0 }
 0x39c   :  { %1188 = vmatpush3.bf16.msra.mxu1 %v1254_v46 }
 0x39d   :  { %1189 = vmatprep.subr.bf16.mxu1 %v1483_v0 }
 0x3a0   :  { %1190 = vmatpush3.bf16.msra.mxu1 %v1255_v47 }
 0x456   :  { %v636_v4 = vpop.f32.mrb[4].mxu1 }
 0x457   :  { %v637_v5 = vadd.f32 %v994_v3, %v636_v4  ;;  %v1153_v6 = vpop.f32.mrb[5].mxu1 }
 0x458   :  { %v639_v7 = vpop.f32.mrb[6].mxu1 }
 0x459   :  { %v642_v8 = vmax.f32 %v637_v5, 0.0  ;;  %v1154_v9 = vpop.f32.mrb[7].mxu1 }
 0x45b   :  { %v645_v10 = vrot.slane %v642_v8, 4  ;;  %v651_v11 = vmul.f32 %v642_v8, %v642_v8 }
 0x45d   :  { %v646_v12 = vadd.f32 %v645_v10, %v642_v8  ;;  %v652_v13 = vrot.slane %v651_v11, 4 }
 0x45f   :  { %v647_v14 = vrot.slane %v646_v12, 2  ;;  %v653_v15 = vadd.f32 %v652_v13, %v651_v11  ;;  %v789_v11 = vld [vmem:[%s1782_s7 + $0xb] sm:$0x1] }
 0x461   :  { %v648_v16 = vadd.f32 %v647_v14, %v646_v12  ;;  %v654_v17 = vrot.slane %v653_v15, 2  ;;  %v790_v14 = vld [vmem:[%s1782_s7 + $0xc] sm:$0x1] }
 0x463   :  { %v649_v18 = vrot.slane %v648_v16, 1  ;;  %v655_v19 = vadd.f32 %v654_v17, %v653_v15 }
 0x465   :  { %v650_v20 = vadd.f32 %v649_v18, %v648_v16  ;;  %v656_v21 = vrot.slane %v655_v19, 1 }
 0x467   :  { %v657_v22 = vadd.f32 %v656_v21, %v655_v19  ;;  %v658_v23 = vmul.f32 0.125, %v650_v20 }
 0x469   :  { %v659_v24 = vmul.f32 0.125, %v657_v22  ;;  %v660_v25 = vmul.f32 %v658_v23, %v658_v23 }
 0x46b   :  { %v661_v26 = vsub.f32 %v659_v24, %v660_v25 }
 0x46d   :  { %v662_v27 = vmax.f32 %v661_v26, 0.0 }
 0x46f   :  { %v663_v28 = vadd.f32 1e-05, %v662_v27 }
 0x471   :  { %1260 = vrsqrt.f32 %v663_v28 }
 0x47b   :  { %v1261_v30 = vpop.eup %1260 }
 0x47c   :  { %v665_v31 = vmul.f32 %v1261_v30, %v643_v29 }
 0x47e   :  { %v671_v33 = vrot.slane %v665_v31, %v1682_v1  ;;  %v666_v34 = vmul.f32 %v665_v31, %v658_v23 }
 0x480   :  { %v667_v35 = vsub.f32 %v644_v32, %v666_v34  ;;  %v672_v36 = vmul.f32 %v671_v33, %v642_v8 }
 0x482   :  { %v676_v37 = vrot.slane %v667_v35, %v1682_v1 }
 0x484   :  { %v677_v38 = vadd.f32 %v676_v37, %v672_v36 }
 0x486   :  { %v695_v39 = vpack.c.bf16 %v677_v38, %v677_v38 }
 0x488   :  { %1172 = vmatmul.mubr.bf16.vlgmr.msra.gmra.mrb[8].mxu0 %v695_v39 }
 0x55b   :  { %v782_v49 = vpop.f32.mrb[8].mxu0 }
 0x55c   :  { %v783_v50 = vadd.f32 %v1003_v48, %v782_v49  ;;  %v1173_v51 = vpop.f32.mrb[9].mxu0 }
 0x55d   :  { %v785_v52 = vpop.f32.mrb[10].mxu0 }
 0x55e   :  { %v788_v53 = vmax.f32 %v783_v50, 0.0  ;;  %v1174_v54 = vpop.f32.mrb[11].mxu0 }
 0x560   :  { %v791_v55 = vrot.slane %v788_v53, 4  ;;  %v797_v56 = vmul.f32 %v788_v53, %v788_v53 }
 0x562   :  { %v792_v57 = vadd.f32 %v791_v55, %v788_v53  ;;  %v798_v58 = vrot.slane %v797_v56, 4 }
 0x564   :  { %v793_v59 = vrot.slane %v792_v57, 2  ;;  %v799_v60 = vadd.f32 %v798_v58, %v797_v56 }
 0x566   :  { %v794_v61 = vadd.f32 %v793_v59, %v792_v57  ;;  %v800_v62 = vrot.slane %v799_v60, 2 }
 0x568   :  { %v795_v0 = vrot.slane %v794_v61, 1  ;;  %v801_v63 = vadd.f32 %v800_v62, %v799_v60 }
 0x56a   :  { %v796_v2 = vadd.f32 %v795_v0, %v794_v61  ;;  %v802_v3 = vrot.slane %v801_v63, 1 }
 0x56c   :  { %v803_v4 = vadd.f32 %v802_v3, %v801_v63  ;;  %v804_v5 = vmul.f32 0.125, %v796_v2 }
 0x56e   :  { %v805_v6 = vmul.f32 0.125, %v803_v4  ;;  %v806_v7 = vmul.f32 %v804_v5, %v804_v5 }
 0x570   :  { %v807_v8 = vsub.f32 %v805_v6, %v806_v7 }
 0x572   :  { %v808_v9 = vmax.f32 %v807_v8, 0.0 }
 0x574   :  { %v809_v10 = vadd.f32 1e-05, %v808_v9 }
 0x576   :  { %1262 = vrsqrt.f32 %v809_v10 }
 0x580   :  { %v1263_v12 = vpop.eup %1262 }
 0x581   :  { %v811_v13 = vmul.f32 %v1263_v12, %v789_v11 }
 0x583   :  { %v817_v15 = vrot.slane %v811_v13, %v1682_v1  ;;  %v812_v16 = vmul.f32 %v811_v13, %v804_v5 }
 0x585   :  { %v813_v17 = vsub.f32 %v790_v14, %v812_v16  ;;  %v818_v18 = vmul.f32 %v817_v15, %v788_v53 }
 0x587   :  { %v822_v19 = vrot.slane %v813_v17, %v1682_v1 }
 0x589   :  { %v823_v20 = vadd.f32 %v822_v19, %v818_v18 }
 0x58b   :  { %v841_v21 = vpack.c.bf16 %v823_v20, %v823_v20 }
 0x58d   :  { %1192 = vmatmul.mubr.bf16.vlgmr.msra.gmra.mrb[8].mxu1 %v841_v21 }
 0x58e   :  { %1429 = shalt.err (!%p1426_p4)
}
 0x58f   :  { %s1430_s27 = scalar_lea.hbm %s1784_s9, 128 }
 0x590   :  { %p1431_p5 = scmp.ne.s32.totalorder %s1784_s9, %s1430_s27  ;;  %p1434_p6 = scmp.lt.u32.totalorder %s1430_s27, %s1784_s9 }
 0x592   :  { %p1436_p7 = pnand %p1434_p6, %p1431_p5 }
 0x594   :  { %1439 = shalt.err (!%p1436_p7)
}
 0x595   :  { %954 = dma.vmem_to_hbm [thread:$0]  %s952_s0, 128, %s1784_s9, [#allocation16]   ;;  %v1012_v1 = vld [vmem:[%s1782_s7 + $0xd] ss:$0 sm:$0xff] }
 0x596   :  { %s1486_s15 = smov [#allocation14]  }
 0x597   :  { %s941_s5 = sshll.u32 %s1486_s15, 4  ;;  %s942_s5 = int_to_ptr.vmem [resolvable:$true] %s941_s5 }
 0x598   :  { %s1440_s26 = scalar_lea.vmem %s942_s5, 128  ;;  %p1445_p9 = scmp.lt.s32.totalorder %s942_s5, %s942_s5 }
 0x599   :  { %p1441_p8 = scmp.ne.s32.totalorder %s942_s5, %s1440_s26  ;;  %p1446_p10 = scmp.lt.s32.totalorder %s1440_s26, %s1440_s26 }
 0x59b   :  { %p1447_p11 = por %p1446_p10, %p1445_p9 }
 0x59d   :  { %p1448_p12 = pnand %p1447_p11, %p1441_p8 }
 0x660   :  { %v928_v22 = vpop.f32.mrb[8].mxu1 }
 0x661   :  { %v929_v23 = vadd.f32 %v1012_v1, %v928_v22  ;;  %v1193_v24 = vpop.f32.mrb[9].mxu1 }
 0x662   :  { %v931_v25 = vpop.f32.mrb[10].mxu1 }
 0x663   :  { %934 = vst [vmem:[#allocation14] sm:$0xff] %v929_v23  ;;  %v1194_v26 = vpop.f32.mrb[11].mxu1 }
 0x664   :  { %1451 = shalt.err (!%p1448_p12)
}
 0x665   :  { %s1452_s7 = scalar_lea.hbm %s1783_s8, 128 }
 0x666   :  { %p1453_p13 = scmp.ne.s32.totalorder %s1783_s8, %s1452_s7  ;;  %p1456_p0 = scmp.lt.u32.totalorder %s1452_s7, %s1783_s8 }
 0x668   :  { %p1458_p1 = pnand %p1456_p0, %p1453_p13 }
 0x66a   :  { %1461 = shalt.err (!%p1458_p1)
}
 0x66b   :  { %944 = dma.vmem_to_hbm [thread:$0]  %s942_s5, 128, %s1783_s8, [#allocation4]  }
 0x66c   :  { %1470 = dma.done.wait [#allocation4], 128  }
 0x66d   :  { %1471 = vsyncadd [#allocation4], 4294967168 }
 0x66e   :  { %1472 = dma.done.wait [#allocation16], 128  }
 0x66f   :  { %1473 = vsyncadd [#allocation16], 4294967168 }
 0x670   :  { %961 = vsyncpa [#allocation3], 1 }
 0x671   :  { %962 = vsyncpa [#allocation6], 1 }
 0x672   :  { %963 = vsyncpa [#allocation9], 1 }
 0x673   :  { %964 = vsyncpa [#allocation12], 1 }
 0x674   :  { %965 = vsyncpa [#allocation4], 1 }
 0x675   :  { %966 = vsyncpa [#allocation16], 1 }

</bundles_post_ra>
